<compile_context>
chip_gen: v7x
topology: tpu7x:2x2x1
jax: 0.10.0
libtpu: 0.0.40
codegen_flags: <defaults>
</compile_context>

<pallas_src>
import jax
import jax.numpy as jnp
from jax.experimental import pallas as pl
from jax.experimental.pallas import tpu as pltpu


def autoencoder_kernel(x_ref, w_ref, b_ref, o_ref):
    # x_ref: (TB, P) bf16 activation tile (feature dim zero-padded to P lanes), pipelined
    # w_ref: (L, P, P) bf16 packed weight slab, zero padded  (VMEM-resident, single-buffered)
    # b_ref: (L, 1, P) f32 packed bias slab, zero padded     (VMEM-resident, single-buffered)
    # o_ref: (TB, P) f32 output tile
    num_layers = w_ref.shape[0]
    h = x_ref[...]                                              # bf16 on entry, f32 after layer 0
    for l in range(num_layers):                                 # fully unrolled (static)
        y = jnp.dot(h.astype(w_ref.dtype), w_ref[l],            # bf16 MXU, f32 accumulation
                    preferred_element_type=jnp.float32) + b_ref[l]
        h = jnp.maximum(y, 0.0) if l < num_layers - 1 else y    # ReLU in f32 (last layer: none)
    # Numerically-stable sigmoid in f32: exp goes to the EUP, no inf intermediates.
    z = jnp.exp(-jnp.abs(h))
    r = 1.0 / (1.0 + z)
    o_ref[...] = jnp.where(h >= 0.0, r, z * r)


def _round_up(n, m):
    return ((n + m - 1) // m) * m


def _cdiv(a, b):
    return -(-a // b)


def pack_params(params, *, compute_dtype=jnp.bfloat16):
    """Pack per-layer (W (in,out), b (1,out)) into two lane-dense zero-padded slabs.

    Call this ONCE at parameter-init time (it emits pads/casts/stacks); the per-call forward
    pass then only touches the activations.  Weights are stored (in, out) so each layer is
    h @ W + b, equivalent to PyTorch's x @ W.T + b with W of shape (out, in).
    """
    all_dims = [params[0][0].shape[0]] + [w.shape[1] for w, _ in params]
    P = _round_up(max(all_dims + [128]), 128)                   # lane-dense padded feature width
    w_slab = jnp.stack([
        jnp.pad(w.astype(compute_dtype), ((0, P - w.shape[0]), (0, P - w.shape[1])))
        for w, _ in params])                                     # (L, P, P) bf16
    b_slab = jnp.stack([
        jnp.pad(b.reshape(1, -1).astype(jnp.float32), ((0, 0), (0, P - b.shape[-1])))
        for _, b in params])                                     # (L, 1, P) f32
    d_out = params[-1][0].shape[1]
    return w_slab, b_slab, d_out


def autoencoder_forward(x, w_slab, b_slab, d_out, *, block_b=512):
    """x: (B, input_dim) float32.  w_slab/b_slab/d_out: output of pack_params()."""
    B, d_in = x.shape
    L, P, _ = w_slab.shape

    # Tiling: bounded padding, bf16-sublane-aligned tile, and >= 2 grid steps so the v7x
    # megacore split over the batch ("parallel") has work for both TensorCores.
    n_tiles = max(2, _cdiv(B, block_b))
    TB = _round_up(_cdiv(B, n_tiles), 16)
    Bp = n_tiles * TB

    # Activations go in as bf16 (first matmul casts them anyway) -> half the input DMA per step.
    x_pad = jnp.pad(x, ((0, Bp - B), (0, P - d_in))).astype(w_slab.dtype)

    cost = pl.CostEstimate(
        flops=2 * Bp * L * P * P,
        transcendentals=Bp * P,
        bytes_accessed=int((x_pad.size + w_slab.size) * w_slab.dtype.itemsize
                           + (b_slab.size + Bp * P) * 4),
    )

    out = pl.pallas_call(
        autoencoder_kernel,
        out_shape=jax.ShapeDtypeStruct((Bp, P), jnp.float32),
        grid=(n_tiles,),
        in_specs=[
            # Activation tile: pipelined / double-buffered across grid steps.
            pl.BlockSpec((TB, P), lambda i: (i, 0)),
            # Weight / bias slabs: constant index_map -> fetched once; single-buffered to avoid
            # wasting a second VMEM buffer on data that never changes.
            pl.BlockSpec((L, P, P), lambda i: (0, 0, 0), pipeline_mode=pl.Buffered(1)),
            pl.BlockSpec((L, 1, P), lambda i: (0, 0, 0), pipeline_mode=pl.Buffered(1)),
        ],
        out_specs=pl.BlockSpec((TB, P), lambda i: (i, 0)),
        compiler_params=pltpu.CompilerParams(
            dimension_semantics=("parallel",)),                 # shard batch tiles across TCs (v7x)
        cost_estimate=cost,
    )(x_pad, w_slab, b_slab)

    return out[:B, :d_out]


def make_params(key, dims):
    """Deterministic init mimicking nn.Linear default (uniform +-1/sqrt(fan_in))."""
    params = []
    for i in range(len(dims) - 1):
        fan_in, fan_out = dims[i], dims[i + 1]
        key, kw, kb = jax.random.split(key, 3)
        bound = 1.0 / jnp.sqrt(fan_in)
        w = jax.random.uniform(kw, (fan_in, fan_out), jnp.float32, -bound, bound)
        b = jax.random.uniform(kb, (1, fan_out), jnp.float32, -bound, bound)
        params.append((w, b))
    return params


def reference_forward(x, params, compute_dtype=jnp.float32):
    h = x
    n = len(params)
    for i, (w, b) in enumerate(params):
        h = jnp.dot(h.astype(compute_dtype), w.astype(compute_dtype),
                    preferred_element_type=jnp.float32) + b
        if i < n - 1:
            h = jnp.maximum(h, 0.0)
    return jax.nn.sigmoid(h)


if __name__ == "__main__":
    # cfg: input_dim=32, layer_dim1=64, layer_dim2=32, layer_dim3=16
    input_dim, d1, d2, d3 = 32, 64, 32, 16
    dims = [input_dim, d1, d2, d3, d2, d1, input_dim]
    batch = 8

    key = jax.random.PRNGKey(0)
    key, kx = jax.random.split(key)
    x = jax.random.normal(kx, (batch, input_dim), jnp.float32)
    params = make_params(key, dims)

    # Pack the weight/bias slabs ONCE (not per forward call).
    w_slab, b_slab, d_out = pack_params(params)

    y = jax.block_until_ready(autoencoder_forward(x, w_slab, b_slab, d_out))
    assert y.shape == (batch, input_dim)
    assert bool(jnp.all(jnp.isfinite(y)))

    # Tight check vs a reference doing the same bf16-matmul / f32-accumulate math.
    y_ref_bf16 = reference_forward(x, params, compute_dtype=jnp.bfloat16)
    assert jnp.allclose(y, y_ref_bf16, atol=1e-4, rtol=1e-4), "mismatch vs bf16-matched reference"

    # Loose check vs the pure-f32 reference (difference is bf16 MXU rounding only).
    y_ref_f32 = reference_forward(x, params, compute_dtype=jnp.float32)
    assert jnp.allclose(y, y_ref_f32, atol=2e-2, rtol=2e-2), "mismatch vs f32 reference"

    print("KERNEL_OK")
</pallas_src>

<mosaic_0001>
module attributes {stable_mosaic.version = 11 : i64} {
  func.func @autoencoder_kernel(%arg0: i32, %arg1: memref<16x128xbf16, #tpu.memory_space<vmem>>, %arg2: memref<6x128x128xbf16, #tpu.memory_space<vmem>>, %arg3: memref<6x1x128xf32, #tpu.memory_space<vmem>>, %arg4: memref<16x128xf32, #tpu.memory_space<vmem>>) attributes {dimension_semantics = [#tpu.dimension_semantics<parallel>], iteration_bounds = array<i64: 2>, scalar_prefetch = 0 : i64, scratch_operands = 0 : i64, tpu.core_type = #tpu.core_type<tc>, window_params = [{transform_indices = @transform_0, window_bounds = array<i64: 16, 128>}, {pipeline_mode = #tpu.pipeline_mode<synchronous>, transform_indices = @transform_1, window_bounds = array<i64: 6, 128, 128>}, {pipeline_mode = #tpu.pipeline_mode<synchronous>, transform_indices = @transform_2, window_bounds = array<i64: 6, 1, 128>}, {transform_indices = @transform_3, window_bounds = array<i64: 16, 128>}]} {
    %c0 = arith.constant 0 : index
    %c0_0 = arith.constant 0 : index
    %0 = vector.load %arg1[%c0, %c0_0] : memref<16x128xbf16, #tpu.memory_space<vmem>>, vector<16x128xbf16>
    %c0_1 = arith.constant 0 : index
    %c0_2 = arith.constant 0 : index
    %c0_3 = arith.constant 0 : index
    %1 = vector.load %arg2[%c0_1, %c0_2, %c0_3] : memref<6x128x128xbf16, #tpu.memory_space<vmem>>, vector<1x128x128xbf16>
    %2 = vector.shape_cast %1 : vector<1x128x128xbf16> to vector<128x128xbf16>
    %cst = arith.constant dense<0.000000e+00> : vector<16x128xf32>
    %3 = tpu.matmul %0, %2, %cst {dimension_numbers = #tpu.dot_dimension_numbers<[1], [0], [0], [1], [0, 0, 1, 1], [], []>} : vector<16x128xbf16>, vector<128x128xbf16>, vector<16x128xf32> -> vector<16x128xf32>
    %c0_4 = arith.constant 0 : index
    %c0_5 = arith.constant 0 : index
    %c0_6 = arith.constant 0 : index
    %4 = vector.load %arg3[%c0_4, %c0_5, %c0_6] : memref<6x1x128xf32, #tpu.memory_space<vmem>>, vector<1x1x128xf32>
    %5 = vector.shape_cast %4 : vector<1x1x128xf32> to vector<1x128xf32>
    %6 = vector.broadcast %5 : vector<1x128xf32> to vector<16x128xf32>
    %7 = arith.addf %3, %6 : vector<16x128xf32>
    %cst_7 = arith.constant 0.000000e+00 : f32
    %8 = vector.broadcast %cst_7 : f32 to vector<16x128xf32>
    %9 = arith.maximumf %7, %8 : vector<16x128xf32>
    %10 = arith.truncf %9 : vector<16x128xf32> to vector<16x128xbf16>
    %c1 = arith.constant 1 : index
    %c0_8 = arith.constant 0 : index
    %c0_9 = arith.constant 0 : index
    %11 = vector.load %arg2[%c1, %c0_8, %c0_9] : memref<6x128x128xbf16, #tpu.memory_space<vmem>>, vector<1x128x128xbf16>
    %12 = vector.shape_cast %11 : vector<1x128x128xbf16> to vector<128x128xbf16>
    %cst_10 = arith.constant dense<0.000000e+00> : vector<16x128xf32>
    %13 = tpu.matmul %10, %12, %cst_10 {dimension_numbers = #tpu.dot_dimension_numbers<[1], [0], [0], [1], [0, 0, 1, 1], [], []>} : vector<16x128xbf16>, vector<128x128xbf16>, vector<16x128xf32> -> vector<16x128xf32>
    %c1_11 = arith.constant 1 : index
    %c0_12 = arith.constant 0 : index
    %c0_13 = arith.constant 0 : index
    %14 = vector.load %arg3[%c1_11, %c0_12, %c0_13] : memref<6x1x128xf32, #tpu.memory_space<vmem>>, vector<1x1x128xf32>
    %15 = vector.shape_cast %14 : vector<1x1x128xf32> to vector<1x128xf32>
    %16 = vector.broadcast %15 : vector<1x128xf32> to vector<16x128xf32>
    %17 = arith.addf %13, %16 : vector<16x128xf32>
    %cst_14 = arith.constant 0.000000e+00 : f32
    %18 = vector.broadcast %cst_14 : f32 to vector<16x128xf32>
    %19 = arith.maximumf %17, %18 : vector<16x128xf32>
    %20 = arith.truncf %19 : vector<16x128xf32> to vector<16x128xbf16>
    %c2 = arith.constant 2 : index
    %c0_15 = arith.constant 0 : index
    %c0_16 = arith.constant 0 : index
    %21 = vector.load %arg2[%c2, %c0_15, %c0_16] : memref<6x128x128xbf16, #tpu.memory_space<vmem>>, vector<1x128x128xbf16>
    %22 = vector.shape_cast %21 : vector<1x128x128xbf16> to vector<128x128xbf16>
    %cst_17 = arith.constant dense<0.000000e+00> : vector<16x128xf32>
    %23 = tpu.matmul %20, %22, %cst_17 {dimension_numbers = #tpu.dot_dimension_numbers<[1], [0], [0], [1], [0, 0, 1, 1], [], []>} : vector<16x128xbf16>, vector<128x128xbf16>, vector<16x128xf32> -> vector<16x128xf32>
    %c2_18 = arith.constant 2 : index
    %c0_19 = arith.constant 0 : index
    %c0_20 = arith.constant 0 : index
    %24 = vector.load %arg3[%c2_18, %c0_19, %c0_20] : memref<6x1x128xf32, #tpu.memory_space<vmem>>, vector<1x1x128xf32>
    %25 = vector.shape_cast %24 : vector<1x1x128xf32> to vector<1x128xf32>
    %26 = vector.broadcast %25 : vector<1x128xf32> to vector<16x128xf32>
    %27 = arith.addf %23, %26 : vector<16x128xf32>
    %cst_21 = arith.constant 0.000000e+00 : f32
    %28 = vector.broadcast %cst_21 : f32 to vector<16x128xf32>
    %29 = arith.maximumf %27, %28 : vector<16x128xf32>
    %30 = arith.truncf %29 : vector<16x128xf32> to vector<16x128xbf16>
    %c3 = arith.constant 3 : index
    %c0_22 = arith.constant 0 : index
    %c0_23 = arith.constant 0 : index
    %31 = vector.load %arg2[%c3, %c0_22, %c0_23] : memref<6x128x128xbf16, #tpu.memory_space<vmem>>, vector<1x128x128xbf16>
    %32 = vector.shape_cast %31 : vector<1x128x128xbf16> to vector<128x128xbf16>
    %cst_24 = arith.constant dense<0.000000e+00> : vector<16x128xf32>
    %33 = tpu.matmul %30, %32, %cst_24 {dimension_numbers = #tpu.dot_dimension_numbers<[1], [0], [0], [1], [0, 0, 1, 1], [], []>} : vector<16x128xbf16>, vector<128x128xbf16>, vector<16x128xf32> -> vector<16x128xf32>
    %c3_25 = arith.constant 3 : index
    %c0_26 = arith.constant 0 : index
    %c0_27 = arith.constant 0 : index
    %34 = vector.load %arg3[%c3_25, %c0_26, %c0_27] : memref<6x1x128xf32, #tpu.memory_space<vmem>>, vector<1x1x128xf32>
    %35 = vector.shape_cast %34 : vector<1x1x128xf32> to vector<1x128xf32>
    %36 = vector.broadcast %35 : vector<1x128xf32> to vector<16x128xf32>
    %37 = arith.addf %33, %36 : vector<16x128xf32>
    %cst_28 = arith.constant 0.000000e+00 : f32
    %38 = vector.broadcast %cst_28 : f32 to vector<16x128xf32>
    %39 = arith.maximumf %37, %38 : vector<16x128xf32>
    %40 = arith.truncf %39 : vector<16x128xf32> to vector<16x128xbf16>
    %c4 = arith.constant 4 : index
    %c0_29 = arith.constant 0 : index
    %c0_30 = arith.constant 0 : index
    %41 = vector.load %arg2[%c4, %c0_29, %c0_30] : memref<6x128x128xbf16, #tpu.memory_space<vmem>>, vector<1x128x128xbf16>
    %42 = vector.shape_cast %41 : vector<1x128x128xbf16> to vector<128x128xbf16>
    %cst_31 = arith.constant dense<0.000000e+00> : vector<16x128xf32>
    %43 = tpu.matmul %40, %42, %cst_31 {dimension_numbers = #tpu.dot_dimension_numbers<[1], [0], [0], [1], [0, 0, 1, 1], [], []>} : vector<16x128xbf16>, vector<128x128xbf16>, vector<16x128xf32> -> vector<16x128xf32>
    %c4_32 = arith.constant 4 : index
    %c0_33 = arith.constant 0 : index
    %c0_34 = arith.constant 0 : index
    %44 = vector.load %arg3[%c4_32, %c0_33, %c0_34] : memref<6x1x128xf32, #tpu.memory_space<vmem>>, vector<1x1x128xf32>
    %45 = vector.shape_cast %44 : vector<1x1x128xf32> to vector<1x128xf32>
    %46 = vector.broadcast %45 : vector<1x128xf32> to vector<16x128xf32>
    %47 = arith.addf %43, %46 : vector<16x128xf32>
    %cst_35 = arith.constant 0.000000e+00 : f32
    %48 = vector.broadcast %cst_35 : f32 to vector<16x128xf32>
    %49 = arith.maximumf %47, %48 : vector<16x128xf32>
    %50 = arith.truncf %49 : vector<16x128xf32> to vector<16x128xbf16>
    %c5 = arith.constant 5 : index
    %c0_36 = arith.constant 0 : index
    %c0_37 = arith.constant 0 : index
    %51 = vector.load %arg2[%c5, %c0_36, %c0_37] : memref<6x128x128xbf16, #tpu.memory_space<vmem>>, vector<1x128x128xbf16>
    %52 = vector.shape_cast %51 : vector<1x128x128xbf16> to vector<128x128xbf16>
    %cst_38 = arith.constant dense<0.000000e+00> : vector<16x128xf32>
    %53 = tpu.matmul %50, %52, %cst_38 {dimension_numbers = #tpu.dot_dimension_numbers<[1], [0], [0], [1], [0, 0, 1, 1], [], []>} : vector<16x128xbf16>, vector<128x128xbf16>, vector<16x128xf32> -> vector<16x128xf32>
    %c5_39 = arith.constant 5 : index
    %c0_40 = arith.constant 0 : index
    %c0_41 = arith.constant 0 : index
    %54 = vector.load %arg3[%c5_39, %c0_40, %c0_41] : memref<6x1x128xf32, #tpu.memory_space<vmem>>, vector<1x1x128xf32>
    %55 = vector.shape_cast %54 : vector<1x1x128xf32> to vector<1x128xf32>
    %56 = vector.broadcast %55 : vector<1x128xf32> to vector<16x128xf32>
    %57 = arith.addf %53, %56 : vector<16x128xf32>
    %58 = math.absf %57 : vector<16x128xf32>
    %cst_42 = arith.constant 0.000000e+00 : f32
    %59 = vector.broadcast %cst_42 : f32 to vector<16x128xf32>
    %60 = arith.subf %59, %58 : vector<16x128xf32>
    %61 = math.exp %60 : vector<16x128xf32>
    %cst_43 = arith.constant 1.000000e+00 : f32
    %62 = vector.broadcast %cst_43 : f32 to vector<16x128xf32>
    %63 = arith.addf %62, %61 : vector<16x128xf32>
    %cst_44 = arith.constant 1.000000e+00 : f32
    %64 = vector.broadcast %cst_44 : f32 to vector<16x128xf32>
    %65 = arith.divf %64, %63 : vector<16x128xf32>
    %cst_45 = arith.constant 0.000000e+00 : f32
    %66 = vector.broadcast %cst_45 : f32 to vector<16x128xf32>
    %67 = arith.cmpf oge, %57, %66 : vector<16x128xf32>
    %68 = arith.mulf %61, %65 : vector<16x128xf32>
    %69 = arith.select %67, %65, %68 : vector<16x128xi1>, vector<16x128xf32>
    %c0_46 = arith.constant 0 : index
    %c0_47 = arith.constant 0 : index
    %70 = vector.load %arg4[%c0_46, %c0_47] : memref<16x128xf32, #tpu.memory_space<vmem>>, vector<16x128xf32>
    tpu.vector_store %arg4[%c0_46, %c0_47], %69 {strides = array<i32>} : memref<16x128xf32, #tpu.memory_space<vmem>>, vector<16x128xf32>,
    return
  }
  func.func @transform_0(%arg0: i32) -> (i32, i32) {
    %c0_i32 = arith.constant 0 : i32
    %c0_i32_0 = arith.constant 0 : i32
    return %arg0, %c0_i32 : i32, i32
  }
  func.func @transform_1(%arg0: i32) -> (i32, i32, i32) {
    %c0_i32 = arith.constant 0 : i32
    %c0_i32_0 = arith.constant 0 : i32
    %c0_i32_1 = arith.constant 0 : i32
    %c0_i32_2 = arith.constant 0 : i32
    return %c0_i32, %c0_i32_0, %c0_i32_1 : i32, i32, i32
  }
  func.func @transform_2(%arg0: i32) -> (i32, i32, i32) {
    %c0_i32 = arith.constant 0 : i32
    %c0_i32_0 = arith.constant 0 : i32
    %c0_i32_1 = arith.constant 0 : i32
    %c0_i32_2 = arith.constant 0 : i32
    return %c0_i32, %c0_i32_0, %c0_i32_1 : i32, i32, i32
  }
  func.func @transform_3(%arg0: i32) -> (i32, i32) {
    %c0_i32 = arith.constant 0 : i32
    %c0_i32_0 = arith.constant 0 : i32
    return %arg0, %c0_i32 : i32, i32
  }
}

</mosaic_0001>

<bundles_post_ra>
// kernel: tpu_custom_call.1
= control target key start
LH: loop header
LB: loop body
LE: loop exit
PB: predicated region body
PF: predicated region fallthrough
CT: control target
= control target key end

     0   :  { %8 = vsyncpa [#allocation3], 0  ;;  %s1851_s0 = inlined_call_operand.hbm [shape: bf16[32,128], index: 0, kind: input, shape index: {}]   ;;  %s1852_s1 = inlined_call_operand.hbm [shape: bf16[6,128,128], index: 1, kind: input, shape index: {}]   ;;  %s1853_s2 = inlined_call_operand.vmem [shape: f32[6,1,128], index: 2, kind: input, shape index: {}]   ;;  %s1854_s3 = inlined_call_operand.hbm [shape: f32[32,128], index: 3, kind: output, shape index: {}]  }
   0x1   :  { %10 = vsyncpa [#allocation3 + $0x1], 0 }
   0x2   :  { %11 = vsyncpa [#allocation6], 0 }
   0x3   :  { %12 = vsyncpa [#allocation4], 0 }
   0x4   :  { %14 = vsyncpa [#allocation4 + $0x1], 0  ;;  %s1562_s12 = smov 0   ;;  %s1564_s13 = smov 0  }
   0x5   :  { %s1566_s14 = smov 0   ;;  %s1568_s15 = smov 0  }
   0x6 LB: > { %s1583_s16 = sadd.s32 4294967295, %s1531_s15   ;;  %s1031_s17 = sadd.s32 4294967294, %s1531_s15   ;;  %s1531_s15 = sphi %s1568_s15, %s1874_s15   ;;  %s1527_s14 = sphi %s1566_s14, %s1873_s14   ;;  %s1523_s13 = sphi %s1564_s13, %s1872_s13   ;;  %s1519_s12 = sphi %s1562_s12, %s1871_s12  }
   0x7   : > { %p40_p0 = scmp.ne.s32.totalorder %s1523_s13, %s1519_s12  ;;  %p1855_p1 = scmp.eq.s32.totalorder %s1583_s16, 0 }
   0x8   : > { %p112_p3 = scmp.eq.s32.totalorder %s1031_s17, 1  ;;  %p1032_p5 = scmp.ge.s32.totalorder %s1531_s15, 1 }
   0x9   : > { %p1592_p4 = por %p1855_p1, %p40_p0  ;;  %p119_p7 = scmp.lt.s32.totalorder %s1531_s15, 3 }
   0xa   : > { %p1597_p6 = por %p112_p3, %p40_p0  ;;  %s1533_s21 = smov [#allocation5]  }
   0xb   : > { %s1858_s18 = scalar_select %p1592_p4, 1, 0 }
   0xc   : > { %s1859_s19 = scalar_select %p1597_p6, 1, 0 }
   0xd   : > { %p1602_p8 = pnand %p1032_p5, %p119_p7  ;;  %s131_s22 = sshll.u32 %s1533_s21, 4  ;;  %s1606_s22 = int_to_ptr.vmem [resolvable:$true] %s131_s22 }
   0xe   : > { %s1618_s24 = sadd.s32 1, %s1531_s15   ;;  %s27_s25 = sadd.s32 1, %s1527_s14 }
   0xf   : > { %s1860_s20 = scalar_select %p1602_p8, 1, 0 }
  0x10   : > { %p1291_p9 = pneg %p1602_p8  ;;  %s24_s26 = ssub.s32 %s1531_s15, %s1618_s24 }
  0x11   : > { %s1403_s29 = scalar_lea.hbm %s1852_s1, 6144 }
  0x12   : > { %p1613_p11 = pnand %p1291_p9, %p1855_p1  ;;  %p1404_p12 = scmp.ne.s32.totalorder %s1852_s1, %s1403_s29 }
  0x13   : > { %p1410_p5 = scmp.lt.u32.totalorder %s1403_s29, %s1852_s1 }
  0x14   : > { %p1405_p13 = pneg %p1613_p11 }
  0x16   : > { %p1406_p0 = pnand %p1405_p13, %p1404_p12 }
  0x18   : > { %p1407_p3 = pneg %p1406_p0 }
  0x1a   : > { %p1412_p7 = pnand %p1410_p5, %p1407_p3 }
  0x1c   : > { %1415 = shalt.err (!%p1412_p7)
}
  0x1d   : > { %s1416_s7 = scalar_lea.vmem %s1606_s22, 6144  ;;  %p1424_p2 = scmp.lt.s32.totalorder %s1606_s22, %s1606_s22 }
  0x1e   : > { %p1417_p9 = scmp.ne.s32.totalorder %s1606_s22, %s1416_s7  ;;  %p1425_p6 = scmp.lt.s32.totalorder %s1416_s7, %s1416_s7 }
  0x20   : > { %p1419_p10 = pnand %p1417_p9, %p1405_p13  ;;  %p1426_p4 = por %p1425_p6, %p1424_p2 }
  0x22   : > { %p1420_p1 = pneg %p1419_p10 }
  0x24   : > { %p1427_p8 = pnand %p1426_p4, %p1420_p1 }
  0x26   : > { %1430 = shalt.err (!%p1427_p8)
}
  0x27   : > { %s1534_s8 = smov 64   ;;  %s1535_s9 = smov 4  }
  0x28   : > { %1294 = dma.hbm_to_vmem [thread:$0]  (!%p1613_p11), %s1852_s1, 6144, %s1606_s22, [#allocation6], %s1534_s8, %s1534_s8, %s1535_s9  }
  0x29   : > { %p25_p1 = scmp.eq.s32.totalorder %s24_s26, 0  ;;  %p34_p2 = scmp.ne.s32.totalorder %s1527_s14, %s1523_s13 }
  0x2a   : > { %p35_p4 = scmp.eq.s32.totalorder %s1531_s15, 0  ;;  %p1304_p6 = scmp.lt.s32.totalorder %s1531_s15, 2 }
  0x2b   : > { %s1652_s17 = scalar_select %p25_p1, %s1527_s14, %s27_s25  }
  0x2c   : > { %p36_p8 = por %p35_p4, %p34_p2  ;;  %p1862_p10 = scmp.eq.s32.totalorder %s1583_s16, 1 }
  0x2d   : > { %s148_s23 = sand.u32 1, %s1527_s14   ;;  %s1107_s27 = sshll.u32 %s1531_s15, 7 }
  0x2e   : > { %p1656_p12 = por %p1862_p10, %p34_p2  ;;  %s1035_s28 = sshll.u32 %s148_s23, 3 }
  0x2f   : > { %s1665_s4 = scalar_lea.hbm %s1851_s0, %s1107_s27  ;;  %s152_s22 = scalar_lea.vmem [#allocation2], %s1035_s28 }
  0x30   : > { %s159_s25 = sshll.u32 %s152_s22, 4  ;;  %p1667_p11 = pnand %p1304_p6, %p36_p8  ;;  %s1671_s25 = int_to_ptr.vmem [resolvable:$true] %s159_s25 }
  0x31   : > { %s1673_s5 = scalar_lea.sflag [#allocation3], %s148_s23  ;;  %s1431_s6 = scalar_lea.hbm %s1665_s4, 128 }
  0x32   : > { %p1432_p13 = scmp.ne.s32.totalorder %s1665_s4, %s1431_s6  ;;  %p1433_p0 = pneg %p1667_p11 }
  0x33   : > { %s1436_s11 = scalar_lea.hbm %s1851_s0, 256  ;;  %p1437_p7 = scmp.lt.u32.totalorder %s1665_s4, %s1851_s0 }
  0x34   : > { %p1434_p3 = pnand %p1433_p0, %p1432_p13  ;;  %p1438_p9 = scmp.lt.u32.totalorder %s1436_s11, %s1431_s6 }
  0x35   : > { %p1440_p2 = scmp.lt.u32.totalorder %s1431_s6, %s1665_s4 }
  0x36   : > { %p1435_p5 = pneg %p1434_p3  ;;  %p1439_p1 = por %p1438_p9, %p1437_p7 }
  0x38   : > { %p1441_p4 = por %p1440_p2, %p1439_p1 }
  0x3a   : > { %p1442_p6 = pnand %p1441_p4, %p1435_p5 }
  0x3c   : > { %1445 = shalt.err (!%p1442_p6)
}
  0x3d   : > { %s1446_s23 = scalar_lea.vmem %s1671_s25, 128  ;;  %s1536_s29 = smov [#allocation2]  }
  0x3e   : > { %p1447_p8 = scmp.ne.s32.totalorder %s1671_s25, %s1446_s23  ;;  %s1451_s30 = sshll.u32 %s1536_s29, 4  ;;  %s1452_s30 = int_to_ptr.vmem [resolvable:$false] %s1451_s30 }
  0x3f   : > { %s1453_s22 = scalar_lea.vmem %s1452_s30, 256  ;;  %p1454_p3 = scmp.lt.s32.totalorder %s1671_s25, %s1452_s30 }
  0x40   : > { %p1449_p10 = pnand %p1447_p8, %p1433_p0  ;;  %p1455_p7 = scmp.lt.s32.totalorder %s1453_s22, %s1446_s23 }
  0x42   : > { %p1450_p13 = pneg %p1449_p10  ;;  %p1456_p9 = por %p1455_p7, %p1454_p3 }
  0x44   : > { %p1457_p1 = pnand %p1456_p9, %p1450_p13 }
  0x46   : > { %1460 = shalt.err (!%p1457_p1)
}
  0x47   : > { %1298 = dma.hbm_to_vmem [thread:$0]  (!%p1667_p11), %s1665_s4, 128, %s1671_s25, %s1673_s5, %s1534_s8, %s1534_s8, %s1535_s9  }
  0x48   : > { %p1865_p0 = scmp.ne.s32.totalorder %s1860_s20, 0 }
  0x49   : > { %s1707_s6 = sand.u32 (!%p1865_p0), 1, %s1523_s13   ;;  %p1866_p5 = scmp.ne.s32.totalorder (!%p1865_p0), %s1858_s18, 0 }
  0x4a   : > { %171 = sbr.rel (%p1865_p0) target bundleno = 1483 (0x5cb), region = 32  ;;  %s1039_s7 = sshll.u32 (!%p1865_p0), %s1707_s6, 3 }
  0x4b   : > { %s174_s10 = scalar_lea.sflag (!%p1865_p0), [#allocation3], %s1707_s6  ;;  %s1711_s11 = scalar_lea.vmem (!%p1865_p0), [#allocation2], %s1039_s7 }
  0x51   : > { %1506 = dma.done.wait (%p1866_p5), %s174_s10, 128  }
  0x52   : > { %1508 = vsyncadd (%p1866_p5), %s174_s10, 4294967168  ;;  %p1867_p11 = scmp.eq.s32.totalorder %s1583_s16, 0 }
  0x54   : > { %1510 = dma.done.wait (%p1867_p11), [#allocation6], 6144   ;;  %p1868_p2 = pmov %p1867_p11 }
  0x55   : > { %v1537_v0 = vmov 0.0   ;;  %vm1538_vm0 = vmmov 0   ;;  %v1346_v1 = vld [vmem:[#allocation5] sm:$0xff]   ;;  %v1347_v2 = vld [vmem:[#allocation5 + $0x8] sm:$0xff]   ;;  %v1348_v3 = vld [vmem:[#allocation5 + $0x10] sm:$0xff]   ;;  %s1041_s30 = sshll.u32 %s1707_s6, 4 }
  0x56   : > { %1512 = vsyncadd (%p1868_p2), [#allocation6], 4294961152  ;;  %1163 = vmatprep.subr.bf16.mxu0 %v1537_v0  ;;  %1179 = vmatprep.mubr.msk.bf16.mxu0 %vm1538_vm0, %v1537_v0  ;;  %v1355_v4 = vld [vmem:[#allocation5 + $0x40] sm:$0xff]   ;;  %v1349_v5 = vld [vmem:[#allocation5 + $0x18] sm:$0xff]   ;;  %s203_s22 = scalar_lea.vmem [#allocation7], %s1041_s30  ;;  %s1108_s10 = sshll.u32 %s1583_s16, 8 }
  0x57   : > { %1183 = vmatprep.subr.bf16.mxu1 %v1537_v0  ;;  %1199 = vmatprep.mubr.msk.bf16.mxu1 %vm1538_vm0, %v1537_v0  ;;  %v1356_v6 = vld [vmem:[#allocation5 + $0x48] sm:$0xff]   ;;  %v1350_v7 = vld [vmem:[#allocation5 + $0x20] sm:$0xff]   ;;  %v1357_v8 = vld [vmem:[#allocation5 + $0x50] sm:$0xff]   ;;  %s948_s7 = sshll.u32 %s203_s22, 4  ;;  %s1807_s20 = scalar_lea.hbm %s1854_s3, %s1108_s10  ;;  %s1802_s7 = int_to_ptr.vmem [resolvable:$true] %s948_s7 }
  0x58   : > { %1164 = vmatpush3.bf16.msra.mxu0 %v1346_v1  ;;  %1184 = vmatpush3.bf16.msra.mxu1 %v1355_v4  ;;  %v1351_v9 = vld [vmem:[#allocation5 + $0x28] sm:$0xff]   ;;  %v1358_v10 = vld [vmem:[#allocation5 + $0x58] sm:$0xff]   ;;  %v1352_v11 = vld [vmem:[#allocation5 + $0x30] sm:$0xff]   ;;  %s935_s16 = scalar_lea.sflag [#allocation4], %s1707_s6  ;;  %s1461_s8 = scalar_lea.vmem %s1802_s7, 256 }
  0x59   : > { %1165 = vmatprep.subr.bf16.mxu0 %v1537_v0  ;;  %1185 = vmatprep.subr.bf16.mxu1 %v1537_v0  ;;  %v1359_v12 = vld [vmem:[#allocation5 + $0x60] sm:$0xff]   ;;  %v1353_v13 = vld [vmem:[#allocation5 + $0x38] sm:$0xff]   ;;  %v1360_v14 = vld [vmem:[#allocation5 + $0x68] sm:$0xff]   ;;  %p1462_p4 = scmp.ne.s32.totalorder %s1802_s7, %s1461_s8  ;;  %s1539_s9 = smov [#allocation7]  }
  0x5a   : > { %v1354_v15 = vld [vmem:[%s1711_s11] sm:$0xff]   ;;  %v1363_v18 = vld [vmem:[#allocation5 + $0x80] sm:$0xff]   ;;  %v1364_v19 = vld [vmem:[#allocation5 + $0x88] sm:$0xff]   ;;  %s1465_s4 = sshll.u32 %s1539_s9, 4  ;;  %s1466_s4 = int_to_ptr.vmem [resolvable:$false] %s1465_s4 }
  0x5b   : > { %v1361_v16 = vld [vmem:[#allocation5 + $0x70] sm:$0xff]   ;;  %v1362_v17 = vld [vmem:[#allocation5 + $0x78] sm:$0xff]   ;;  %v1367_v22 = vld [vmem:[#allocation5 + $0xa0] sm:$0xff]   ;;  %p1463_p6 = pnand %p1462_p4, %p1656_p12  ;;  %s1467_s25 = scalar_lea.vmem %s1466_s4, 512 }
  0x5c   : > { %1166 = vmatpush3.bf16.msra.mxu0 %v1347_v2  ;;  %1186 = vmatpush3.bf16.msra.mxu1 %v1356_v6  ;;  %v1365_v20 = vld [vmem:[#allocation5 + $0x90] sm:$0xff]   ;;  %v1366_v21 = vld [vmem:[#allocation5 + $0x98] sm:$0xff]   ;;  %v1368_v23 = vld [vmem:[#allocation5 + $0xa8] sm:$0xff]   ;;  %p1468_p10 = scmp.lt.s32.totalorder %s1802_s7, %s1466_s4  ;;  %p1469_p13 = scmp.lt.s32.totalorder %s1467_s25, %s1461_s8 }
  0x5d   : > { %1167 = vmatprep.subr.bf16.mxu0 %v1537_v0  ;;  %1187 = vmatprep.subr.bf16.mxu1 %v1537_v0  ;;  %v1042_v24 = vld [vmem:[%s1853_s2] ss:$0 sm:$0xff]  ;;  %v1370_v35 = vld [vmem:[#allocation5 + $0xb8] sm:$0xff]   ;;  %v1371_v36 = vld [vmem:[#allocation5 + $0xc0] sm:$0xff]   ;;  %p1464_p8 = pneg %p1463_p6 }
  0x5e   : > { %v1369_v34 = vld [vmem:[#allocation5 + $0xb0] sm:$0xff]   ;;  %v1372_v37 = vld [vmem:[#allocation5 + $0xc8] sm:$0xff]   ;;  %v1374_v39 = vld [vmem:[#allocation5 + $0xd8] sm:$0xff]   ;;  %p1470_p3 = por %p1469_p13, %p1468_p10 }
  0x5f   : > { %v1373_v38 = vld [vmem:[#allocation5 + $0xd0] sm:$0xff]   ;;  %v1375_v40 = vld [vmem:[#allocation5 + $0xe0] sm:$0xff]   ;;  %v1376_v41 = vld [vmem:[#allocation5 + $0xe8] sm:$0xff]  }
  0x60   : > { %1168 = vmatpush3.bf16.msra.mxu0 %v1348_v3  ;;  %1188 = vmatpush3.bf16.msra.mxu1 %v1357_v8  ;;  %v1053_v42 = vld [vmem:[%s1853_s2 + $0x1] ss:$0 sm:$0xff]  ;;  %v1378_v53 = vld [vmem:[#allocation5 + $0xf8] sm:$0xff]   ;;  %v1379_v54 = vld [vmem:[#allocation5 + $0x100] sm:$0xff]   ;;  %p1471_p7 = pnand %p1470_p3, %p1464_p8 }
  0x61   : > { %1169 = vmatprep.subr.bf16.mxu0 %v1537_v0  ;;  %1189 = vmatprep.subr.bf16.mxu1 %v1537_v0  ;;  %v1377_v52 = vld [vmem:[#allocation5 + $0xf0] sm:$0xff]   ;;  %v1380_v55 = vld [vmem:[#allocation5 + $0x108] sm:$0xff]   ;;  %v1382_v57 = vld [vmem:[#allocation5 + $0x118] sm:$0xff]  }
  0x62   : > { %v1381_v56 = vld [vmem:[#allocation5 + $0x110] sm:$0xff]   ;;  %v1383_v58 = vld [vmem:[#allocation5 + $0x120] sm:$0xff]   ;;  %v1384_v59 = vld [vmem:[#allocation5 + $0x128] sm:$0xff]  }
  0x63   : > { %v1063_v60 = vld [vmem:[%s1853_s2 + $0x2] ss:$0 sm:$0xff]  ;;  %v1386_v8 = vld [vmem:[#allocation5 + $0x138] sm:$0xff]  }
  0x64   : > { %1170 = vmatpush3.bf16.msra.mxu0 %v1349_v5  ;;  %1190 = vmatpush3.bf16.msra.mxu1 %v1358_v10  ;;  %v1388_v10 = vld [vmem:[#allocation5 + $0x148] sm:$0xff]  }
  0x65   : > { %1171 = vmatprep.subr.bf16.mxu0 %v1537_v0  ;;  %1191 = vmatprep.subr.bf16.mxu1 %v1537_v0 }
  0x68   : > { %1172 = vmatpush3.bf16.msra.mxu0 %v1350_v7  ;;  %1192 = vmatpush3.bf16.msra.mxu1 %v1359_v12  ;;  %v1385_v7 = vld [vmem:[#allocation5 + $0x130] sm:$0xff]   ;;  %v1390_v12 = vld [vmem:[#allocation5 + $0x158] sm:$0xff]  }
  0x69   : > { %1173 = vmatprep.subr.bf16.mxu0 %v1537_v0  ;;  %1193 = vmatprep.subr.bf16.mxu1 %v1537_v0 }
  0x6c   : > { %1174 = vmatpush3.bf16.msra.mxu0 %v1351_v9  ;;  %1194 = vmatpush3.bf16.msra.mxu1 %v1360_v14  ;;  %v1387_v9 = vld [vmem:[#allocation5 + $0x140] sm:$0xff]   ;;  %v1392_v14 = vld [vmem:[#allocation5 + $0x168] sm:$0xff]  }
  0x6d   : > { %1175 = vmatprep.subr.bf16.mxu0 %v1537_v0  ;;  %1195 = vmatprep.subr.bf16.mxu1 %v1537_v0 }
  0x70   : > { %1176 = vmatpush3.bf16.msra.mxu0 %v1352_v11  ;;  %1196 = vmatpush3.bf16.msra.mxu1 %v1361_v16  ;;  %v1389_v11 = vld [vmem:[#allocation5 + $0x150] sm:$0xff]  }
  0x71   : > { %1177 = vmatprep.subr.bf16.mxu0 %v1537_v0  ;;  %1197 = vmatprep.subr.bf16.mxu1 %v1537_v0 }
  0x74   : > { %1178 = vmatpush3.bf16.msra.mxu0 %v1353_v13  ;;  %1198 = vmatpush3.bf16.msra.mxu1 %v1362_v17  ;;  %v1391_v13 = vld [vmem:[#allocation5 + $0x160] sm:$0xff]  }
  0x75   : > { %1203 = vmatprep.subr.bf16.mxu0 %v1537_v0  ;;  %1223 = vmatprep.subr.bf16.mxu1 %v1537_v0 }
  0x77   : > { %1180 = vmatmul.mubr.bf16.vlgmr.msra.gmra.mrb[0].mxu0 %v1354_v15  ;;  %v1073_v15 = vld [vmem:[%s1853_s2 + $0x3] ss:$0 sm:$0xff] }
  0x78   : > { %1219 = vmatprep.mubr.msk.bf16.mxu0 %vm1538_vm0, %v1537_v0  ;;  %1204 = vmatpush3.bf16.msra.mxu0 %v1363_v18 }
  0x79   : > { %1205 = vmatprep.subr.bf16.mxu0 %v1537_v0 }
  0x7c   : > { %1206 = vmatpush3.bf16.msra.mxu0 %v1364_v19 }
  0x7d   : > { %1207 = vmatprep.subr.bf16.mxu0 %v1537_v0 }
  0x80   : > { %1208 = vmatpush3.bf16.msra.mxu0 %v1365_v20 }
  0x81   : > { %1209 = vmatprep.subr.bf16.mxu0 %v1537_v0 }
  0x84   : > { %1210 = vmatpush3.bf16.msra.mxu0 %v1366_v21 }
  0x85   : > { %1211 = vmatprep.subr.bf16.mxu0 %v1537_v0 }
  0x88   : > { %1212 = vmatpush3.bf16.msra.mxu0 %v1367_v22 }
  0x89   : > { %1213 = vmatprep.subr.bf16.mxu0 %v1537_v0 }
  0x8c   : > { %1214 = vmatpush3.bf16.msra.mxu0 %v1368_v23 }
  0x8d   : > { %1215 = vmatprep.subr.bf16.mxu0 %v1537_v0 }
  0x90   : > { %1216 = vmatpush3.bf16.msra.mxu0 %v1369_v34 }
  0x91   : > { %1217 = vmatprep.subr.bf16.mxu0 %v1537_v0 }
  0x94   : > { %1218 = vmatpush3.bf16.msra.mxu0 %v1370_v35 }
  0x95   : > { %1243 = vmatprep.subr.bf16.mxu0 %v1537_v0 }
 0x14a   : > { %v320_v25 = vpop.f32.mrb[0].mxu0 }
 0x14b   : > { %v321_v26 = vadd.f32 %v1042_v24, %v320_v25  ;;  %v1181_v27 = vpop.f32.mrb[1].mxu0  ;;  %v1393_v25 = vld [vmem:[#allocation5 + $0x170] sm:$0xff]  }
 0x14c   : > { %v323_v28 = vpop.f32.mrb[2].mxu0  ;;  %v1083_v27 = vld [vmem:[%s1853_s2 + $0x4] ss:$0 sm:$0xff] }
 0x14d   : > { %v324_v29 = vadd.f32 %v1042_v24, %v323_v28  ;;  %v1182_v30 = vpop.f32.mrb[3].mxu0  ;;  %v327_v31 = vmax.f32 %v321_v26, 0.0  ;;  %v1394_v26 = vld [vmem:[#allocation5 + $0x178] sm:$0xff]  }
 0x14f   : > { %v328_v32 = vmax.f32 %v324_v29, 0.0 }
 0x151   : > { %v329_v33 = vpack.c.bf16 %v328_v32, %v327_v31 }
 0x153   : > { %1200 = vmatmul.mubr.bf16.vlgmr.msra.gmra.mrb[0].mxu1 %v329_v33 }
 0x154   : > { %1239 = vmatprep.mubr.msk.bf16.mxu1 %vm1538_vm0, %v1537_v0  ;;  %1224 = vmatpush3.bf16.msra.mxu1 %v1371_v36 }
 0x155   : > { %1225 = vmatprep.subr.bf16.mxu1 %v1537_v0 }
 0x158   : > { %1226 = vmatpush3.bf16.msra.mxu1 %v1372_v37 }
 0x159   : > { %1227 = vmatprep.subr.bf16.mxu1 %v1537_v0 }
 0x15c   : > { %1228 = vmatpush3.bf16.msra.mxu1 %v1373_v38 }
 0x15d   : > { %1229 = vmatprep.subr.bf16.mxu1 %v1537_v0 }
 0x160   : > { %1230 = vmatpush3.bf16.msra.mxu1 %v1374_v39 }
 0x161   : > { %1231 = vmatprep.subr.bf16.mxu1 %v1537_v0 }
 0x164   : > { %1232 = vmatpush3.bf16.msra.mxu1 %v1375_v40 }
 0x165   : > { %1233 = vmatprep.subr.bf16.mxu1 %v1537_v0 }
 0x168   : > { %1234 = vmatpush3.bf16.msra.mxu1 %v1376_v41 }
 0x169   : > { %1235 = vmatprep.subr.bf16.mxu1 %v1537_v0 }
 0x16c   : > { %1236 = vmatpush3.bf16.msra.mxu1 %v1377_v52 }
 0x16d   : > { %1237 = vmatprep.subr.bf16.mxu1 %v1537_v0 }
 0x170   : > { %1238 = vmatpush3.bf16.msra.mxu1 %v1378_v53 }
 0x171   : > { %1263 = vmatprep.subr.bf16.mxu1 %v1537_v0 }
 0x226   : > { %v437_v43 = vpop.f32.mrb[0].mxu1 }
 0x227   : > { %v438_v44 = vadd.f32 %v1053_v42, %v437_v43  ;;  %v1201_v45 = vpop.f32.mrb[1].mxu1 }
 0x228   : > { %v440_v46 = vpop.f32.mrb[2].mxu1 }
 0x229   : > { %v441_v47 = vadd.f32 %v1053_v42, %v440_v46  ;;  %v1202_v48 = vpop.f32.mrb[3].mxu1  ;;  %v444_v49 = vmax.f32 %v438_v44, 0.0 }
 0x22b   : > { %v445_v50 = vmax.f32 %v441_v47, 0.0 }
 0x22d   : > { %v446_v51 = vpack.c.bf16 %v445_v50, %v444_v49 }
 0x22f   : > { %1220 = vmatmul.mubr.bf16.vlgmr.msra.gmra.mrb[4].mxu0 %v446_v51 }
 0x230   : > { %1259 = vmatprep.mubr.msk.bf16.mxu0 %vm1538_vm0, %v1537_v0  ;;  %1244 = vmatpush3.bf16.msra.mxu0 %v1379_v54 }
 0x231   : > { %1245 = vmatprep.subr.bf16.mxu0 %v1537_v0 }
 0x234   : > { %1246 = vmatpush3.bf16.msra.mxu0 %v1380_v55 }
 0x235   : > { %1247 = vmatprep.subr.bf16.mxu0 %v1537_v0 }
 0x238   : > { %1248 = vmatpush3.bf16.msra.mxu0 %v1381_v56 }
 0x239   : > { %1249 = vmatprep.subr.bf16.mxu0 %v1537_v0 }
 0x23c   : > { %1250 = vmatpush3.bf16.msra.mxu0 %v1382_v57 }
 0x23d   : > { %1251 = vmatprep.subr.bf16.mxu0 %v1537_v0 }
 0x240   : > { %1252 = vmatpush3.bf16.msra.mxu0 %v1383_v58 }
 0x241   : > { %1253 = vmatprep.subr.bf16.mxu0 %v1537_v0 }
 0x244   : > { %1254 = vmatpush3.bf16.msra.mxu0 %v1384_v59 }
 0x245   : > { %1255 = vmatprep.subr.bf16.mxu0 %v1537_v0 }
 0x248   : > { %1256 = vmatpush3.bf16.msra.mxu0 %v1385_v7 }
 0x249   : > { %1257 = vmatprep.subr.bf16.mxu0 %v1537_v0 }
 0x24c   : > { %1258 = vmatpush3.bf16.msra.mxu0 %v1386_v8 }
 0x302   : > { %v554_v61 = vpop.f32.mrb[4].mxu0 }
 0x303   : > { %v555_v62 = vadd.f32 %v1063_v60, %v554_v61  ;;  %v1221_v63 = vpop.f32.mrb[5].mxu0 }
 0x304   : > { %v557_v1 = vpop.f32.mrb[6].mxu0 }
 0x305   : > { %v558_v2 = vadd.f32 %v1063_v60, %v557_v1  ;;  %v1222_v3 = vpop.f32.mrb[7].mxu0  ;;  %v561_v4 = vmax.f32 %v555_v62, 0.0 }
 0x307   : > { %v562_v5 = vmax.f32 %v558_v2, 0.0 }
 0x309   : > { %v563_v6 = vpack.c.bf16 %v562_v5, %v561_v4 }
 0x30b   : > { %1240 = vmatmul.mubr.bf16.vlgmr.msra.gmra.mrb[4].mxu1 %v563_v6 }
 0x30c   : > { %1279 = vmatprep.mubr.msk.bf16.mxu1 %vm1538_vm0, %v1537_v0  ;;  %1264 = vmatpush3.bf16.msra.mxu1 %v1387_v9 }
 0x30d   : > { %1265 = vmatprep.subr.bf16.mxu1 %v1537_v0 }
 0x310   : > { %1266 = vmatpush3.bf16.msra.mxu1 %v1388_v10 }
 0x311   : > { %1267 = vmatprep.subr.bf16.mxu1 %v1537_v0 }
 0x314   : > { %1268 = vmatpush3.bf16.msra.mxu1 %v1389_v11 }
 0x315   : > { %1269 = vmatprep.subr.bf16.mxu1 %v1537_v0 }
 0x318   : > { %1270 = vmatpush3.bf16.msra.mxu1 %v1390_v12 }
 0x319   : > { %1271 = vmatprep.subr.bf16.mxu1 %v1537_v0 }
 0x31c   : > { %1272 = vmatpush3.bf16.msra.mxu1 %v1391_v13 }
 0x31d   : > { %1273 = vmatprep.subr.bf16.mxu1 %v1537_v0 }
 0x320   : > { %1274 = vmatpush3.bf16.msra.mxu1 %v1392_v14 }
 0x321   : > { %1275 = vmatprep.subr.bf16.mxu1 %v1537_v0 }
 0x324   : > { %1276 = vmatpush3.bf16.msra.mxu1 %v1393_v25 }
 0x325   : > { %1277 = vmatprep.subr.bf16.mxu1 %v1537_v0  ;;  %v1093_v0 = vld [vmem:[%s1853_s2 + $0x5] ss:$0 sm:$0xff] }
 0x328   : > { %1278 = vmatpush3.bf16.msra.mxu1 %v1394_v26 }
 0x3de   : > { %v671_v16 = vpop.f32.mrb[4].mxu1 }
 0x3df   : > { %v672_v17 = vadd.f32 %v1073_v15, %v671_v16  ;;  %v1241_v18 = vpop.f32.mrb[5].mxu1 }
 0x3e0   : > { %v674_v19 = vpop.f32.mrb[6].mxu1 }
 0x3e1   : > { %v675_v20 = vadd.f32 %v1073_v15, %v674_v19  ;;  %v1242_v21 = vpop.f32.mrb[7].mxu1  ;;  %v678_v22 = vmax.f32 %v672_v17, 0.0 }
 0x3e3   : > { %v679_v23 = vmax.f32 %v675_v20, 0.0 }
 0x3e5   : > { %v680_v24 = vpack.c.bf16 %v679_v23, %v678_v22 }
 0x3e7   : > { %1260 = vmatmul.mubr.bf16.vlgmr.msra.gmra.mrb[8].mxu0 %v680_v24 }
 0x4ba   : > { %v788_v28 = vpop.f32.mrb[8].mxu0 }
 0x4bb   : > { %v789_v29 = vadd.f32 %v1083_v27, %v788_v28  ;;  %v1261_v30 = vpop.f32.mrb[9].mxu0 }
 0x4bc   : > { %v791_v31 = vpop.f32.mrb[10].mxu0 }
 0x4bd   : > { %v792_v32 = vadd.f32 %v1083_v27, %v791_v31  ;;  %v1262_v33 = vpop.f32.mrb[11].mxu0  ;;  %v795_v34 = vmax.f32 %v789_v29, 0.0 }
 0x4bf   : > { %v796_v35 = vmax.f32 %v792_v32, 0.0 }
 0x4c1   : > { %v797_v36 = vpack.c.bf16 %v796_v35, %v795_v34 }
 0x4c3   : > { %1280 = vmatmul.mubr.bf16.vlgmr.msra.gmra.mrb[8].mxu1 %v797_v36 }
 0x596   : > { %v905_v37 = vpop.f32.mrb[8].mxu1 }
 0x597   : > { %v906_v38 = vadd.f32 %v1093_v0, %v905_v37  ;;  %v1281_v39 = vpop.f32.mrb[9].mxu1 }
 0x598   : > { %v908_v40 = vpop.f32.mrb[10].mxu1 }
 0x599   : > { %v912_v41 = vand.u32 2147483647, %v906_v38  ;;  %v909_v42 = vadd.f32 %v1093_v0, %v908_v40  ;;  %v1282_v43 = vpop.f32.mrb[11].mxu1  ;;  %vm926_vm1 = vcmp.ge.f32.partialorder %v906_v38, 0.0 }
 0x59b   : > { %v914_v44 = vsub.f32 0.0, %v912_v41  ;;  %v913_v45 = vand.u32 2147483647, %v909_v42  ;;  %vm927_vm2 = vcmp.ge.f32.partialorder %v909_v42, 0.0 }
 0x59d   : > { %v916_v46 = vmul.f32 1.442695, %v914_v44  ;;  %v915_v47 = vsub.f32 0.0, %v913_v45 }
 0x59f   : > { %1395 = vpow2.f32 %v916_v46  ;;  %v918_v48 = vmul.f32 1.442695, %v915_v47 }
 0x5a1   : > { %1397 = vpow2.f32 %v918_v48 }
 0x5a9   : > { %v1396_v49 = vpop.eup %1395 }
 0x5aa   : > { %v920_v50 = vadd.f32 1.0, %v1396_v49 }
 0x5ab   : > { %v1398_v51 = vpop.eup %1397 }
 0x5ac   : > { %1399 = vrcp.f32 %v920_v50  ;;  %v921_v52 = vadd.f32 1.0, %v1398_v51 }
 0x5ae   : > { %1401 = vrcp.f32 %v921_v52 }
 0x5b6   : > { %v1400_v53 = vpop.eup %1399 }
 0x5b7   : > { %v928_v54 = vmul.f32 %v1400_v53, %v1396_v49 }
 0x5b8   : > { %v1402_v55 = vpop.eup %1401 }
 0x5b9   : > { %v930_v56 = vsel %vm926_vm1, %v1400_v53, %v928_v54  ;;  %v929_v57 = vmul.f32 %v1402_v55, %v1398_v51 }
 0x5ba   : > { %932 = vst [vmem:[%s203_s22] sm:$0xff] %v930_v56 }
 0x5bb   : > { %v931_v58 = vsel %vm927_vm2, %v1402_v55, %v929_v57 }
 0x5bc   : > { %933 = vst [vmem:[%s203_s22 + $0x8] sm:$0xff] %v931_v58 }
 0x5bd   : > { %1474 = shalt.err (!%p1471_p7)
}
 0x5be   : > { %s1475_s26 = scalar_lea.hbm %s1807_s20, 256  ;;  %s1479_s28 = scalar_lea.hbm %s1854_s3, 512 }
 0x5bf   : > { %p1476_p9 = scmp.ne.s32.totalorder %s1807_s20, %s1475_s26  ;;  %p1480_p5 = scmp.lt.u32.totalorder %s1807_s20, %s1854_s3 }
 0x5c0   : > { %p1481_p11 = scmp.lt.u32.totalorder %s1479_s28, %s1475_s26  ;;  %p1483_p4 = scmp.lt.u32.totalorder %s1475_s26, %s1807_s20 }
 0x5c1   : > { %p1477_p1 = pnand %p1476_p9, %p1656_p12 }
 0x5c2   : > { %p1482_p2 = por %p1481_p11, %p1480_p5 }
 0x5c3   : > { %p1478_p0 = pneg %p1477_p1 }
 0x5c4   : > { %p1484_p6 = por %p1483_p4, %p1482_p2 }
 0x5c6   : > { %p1485_p8 = pnand %p1484_p6, %p1478_p0 }
 0x5c8   : > { %1488 = shalt.err (!%p1485_p8)
}
 0x5c9   : > { %s1540_s30 = smov 128   ;;  %s1541_s22 = smov 8  }
 0x5ca   : > { %1289 = dma.vmem_to_hbm [thread:$0]  (%p1656_p12), %s1802_s7, 256, %s1807_s20, %s935_s16, %s1540_s30, %s1540_s30, %s1541_s22  }
 0x5cb PF: > { %s963_s10 = sand.u32 1, %s1519_s12   ;;  %p1869_p10 = scmp.ne.s32.totalorder %s1859_s19, 0 }
 0x5cc   : > { %p1870_p13 = scmp.ge.s32.totalorder %s1531_s15, 2  ;;  %s964_s11 = scalar_lea.sflag [#allocation4], %s963_s10 }
 0x5ce   : > { %p1300_p3 = pnand %p1870_p13, %p1869_p10 }
 0x5d0   : > { %1514 = dma.done.wait (!%p1300_p3), %s964_s11, 256  }
 0x5d1   : > { %1516 = vsyncadd (!%p1300_p3), %s964_s11, 4294967040  ;;  %p17_p7 = scmp.ge.s32.totalorder %s1618_s24, 4   ;;  %s1871_s12 = smov %s1523_s13 }
 0x5d2   : > { %s1872_s13 = smov %s1527_s14  ;;  %s1873_s14 = smov %s1652_s17 }
 0x5d3   : > { %s1874_s15 = smov %s1618_s24  ;;  %19 = sbr.rel (!%p17_p7) target bundleno = 6 (0x6), region = 91 }
 0x5da   :  { %969 = vsyncpa [#allocation3], 1 }
 0x5db   :  { %971 = vsyncpa [#allocation3 + $0x1], 1 }
 0x5dc   :  { %972 = vsyncpa [#allocation6], 1 }
 0x5dd   :  { %973 = vsyncpa [#allocation4], 1 }
 0x5de   :  { %975 = vsyncpa [#allocation4 + $0x1], 1 }

</bundles_post_ra>
